<compile_context>
chip_gen: v7x
topology: tpu7x:2x2x1
jax: 0.10.0
libtpu: 0.0.40
codegen_flags: <defaults>
</compile_context>

<pallas_src>
import jax
import jax.numpy as jnp
from jax.experimental import pallas as pl
from jax.experimental.pallas import tpu as pltpu


def conv1x1_kernel(x_ref, w_ref, b_ref, o_ref):
    # x_ref: (Cin, L) f32 in VMEM   -- lane-dense along fused B*H*W
    # w_ref: (Cout*Cin,) f32 in SMEM (row-major: w[o, c] at o*Cin + c)
    # b_ref: (Cout,)     f32 in SMEM
    # o_ref: (Cout, L)   f32 in VMEM
    cin = x_ref.shape[0]
    cout = o_ref.shape[0]

    rows = []
    for o in range(cout):                    # Cout = 2: fully unrolled
        acc = x_ref[0:1, :] * w_ref[o * cin + 0]
        for c in range(1, cin):              # Cin = 3: fully unrolled VPU FMA
            acc = acc + x_ref[c:c + 1, :] * w_ref[o * cin + c]
        rows.append(acc + b_ref[o])
    o_ref[...] = jnp.concatenate(rows, axis=0).astype(o_ref.dtype)


def match_head_forward(x, weight, bias, *, lane_tile=None):
    """x: (B, Cin, H, W) f32; weight: (Cout, Cin) f32; bias: (Cout,) f32."""
    B, Cin, H, W = x.shape
    Cout = weight.shape[0]
    L = B * H * W

    # Fold batch + spatial onto the lane axis.
    x_lanes = jnp.transpose(x, (1, 0, 2, 3)).reshape(Cin, L)
    w_flat = weight.reshape(Cout * Cin)

    # Small shapes: one grid step over the full lane axis.
    # Large shapes: tile the fused lane axis with >=2048-lane blocks.
    if lane_tile is None:
        lane_tile = L if L <= 4096 else 2048
    if L % lane_tile != 0:
        lane_tile = L
    num_tiles = L // lane_tile

    compiler_params = None
    if num_tiles > 1:
        compiler_params = pltpu.CompilerParams(
            dimension_semantics=("parallel",))

    out_lanes = pl.pallas_call(
        conv1x1_kernel,
        out_shape=jax.ShapeDtypeStruct((Cout, L), x.dtype),
        grid=(num_tiles,),
        in_specs=[
            pl.BlockSpec((Cin, lane_tile), lambda i: (0, i)),
            pl.BlockSpec(memory_space=pltpu.MemorySpace.SMEM),
            pl.BlockSpec(memory_space=pltpu.MemorySpace.SMEM),
        ],
        out_specs=pl.BlockSpec((Cout, lane_tile), lambda i: (0, i)),
        compiler_params=compiler_params,
    )(x_lanes, w_flat, bias)

    return out_lanes.reshape(Cout, B, H, W).transpose(1, 0, 2, 3)


# ---------------- pure-JAX reference (mirrors the PyTorch forward) ----------------
def reference_forward(x, weight, bias):
    return jnp.einsum('oc,bchw->bohw', weight, x) + bias[None, :, None, None]


if __name__ == "__main__":
    # Shapes implied by the module: Conv2d(3 -> 2, k=1). Small example input.
    B, Cin, H, W = 2, 3, 16, 16
    Cout = 2

    key = jax.random.PRNGKey(0)
    kx, kw, kb = jax.random.split(key, 3)
    x = jax.random.normal(kx, (B, Cin, H, W), jnp.float32)
    # PyTorch weight is (Cout, Cin, 1, 1); the squeezed (Cout, Cin) matrix is
    # equivalent for a 1x1 kernel.
    weight = 0.5 * jax.random.normal(kw, (Cout, Cin), jnp.float32)
    bias = 0.1 * jax.random.normal(kb, (Cout,), jnp.float32)

    out = jax.block_until_ready(match_head_forward(x, weight, bias))

    ref = reference_forward(x, weight, bias)
    assert out.shape == (B, Cout, H, W)
    assert jnp.allclose(out, ref, atol=1e-5, rtol=1e-5), \
        f"max abs err {jnp.max(jnp.abs(out - ref))}"

    print("KERNEL_OK")
</pallas_src>

<mosaic_0001>
module attributes {stable_mosaic.version = 11 : i64} {
  func.func @conv1x1_kernel(%arg0: i32, %arg1: memref<3x512xf32, #tpu.memory_space<vmem>>, %arg2: memref<6xf32, #tpu.memory_space<smem>>, %arg3: memref<2xf32, #tpu.memory_space<smem>>, %arg4: memref<2x512xf32, #tpu.memory_space<vmem>>) attributes {dimension_semantics = [#tpu.dimension_semantics<arbitrary>], iteration_bounds = array<i64: 1>, scalar_prefetch = 0 : i64, scratch_operands = 0 : i64, tpu.core_type = #tpu.core_type<tc>, window_params = [{transform_indices = @transform_0, window_bounds = array<i64: 3, 512>}, {transform_indices = @transform_1, window_bounds = array<i64: 6>}, {transform_indices = @transform_2, window_bounds = array<i64: 2>}, {transform_indices = @transform_3, window_bounds = array<i64: 2, 512>}]} {
    %c0 = arith.constant 0 : index
    %c0_0 = arith.constant 0 : index
    %0 = vector.load %arg1[%c0, %c0_0] : memref<3x512xf32, #tpu.memory_space<vmem>>, vector<1x512xf32>
    %c0_1 = arith.constant 0 : index
    %1 = memref.load %arg2[%c0_1] : memref<6xf32, #tpu.memory_space<smem>>
    %2 = vector.broadcast %1 : f32 to vector<1x512xf32>
    %3 = arith.mulf %0, %2 : vector<1x512xf32>
    %c1 = arith.constant 1 : index
    %c0_2 = arith.constant 0 : index
    %4 = vector.load %arg1[%c1, %c0_2] : memref<3x512xf32, #tpu.memory_space<vmem>>, vector<1x512xf32>
    %c1_3 = arith.constant 1 : index
    %5 = memref.load %arg2[%c1_3] : memref<6xf32, #tpu.memory_space<smem>>
    %6 = vector.broadcast %5 : f32 to vector<1x512xf32>
    %7 = arith.mulf %4, %6 : vector<1x512xf32>
    %8 = arith.addf %3, %7 : vector<1x512xf32>
    %c2 = arith.constant 2 : index
    %c0_4 = arith.constant 0 : index
    %9 = vector.load %arg1[%c2, %c0_4] : memref<3x512xf32, #tpu.memory_space<vmem>>, vector<1x512xf32>
    %c2_5 = arith.constant 2 : index
    %10 = memref.load %arg2[%c2_5] : memref<6xf32, #tpu.memory_space<smem>>
    %11 = vector.broadcast %10 : f32 to vector<1x512xf32>
    %12 = arith.mulf %9, %11 : vector<1x512xf32>
    %13 = arith.addf %8, %12 : vector<1x512xf32>
    %c0_6 = arith.constant 0 : index
    %14 = memref.load %arg3[%c0_6] : memref<2xf32, #tpu.memory_space<smem>>
    %15 = vector.broadcast %14 : f32 to vector<1x512xf32>
    %16 = arith.addf %13, %15 : vector<1x512xf32>
    %c0_7 = arith.constant 0 : index
    %c0_8 = arith.constant 0 : index
    %17 = vector.load %arg1[%c0_7, %c0_8] : memref<3x512xf32, #tpu.memory_space<vmem>>, vector<1x512xf32>
    %c3 = arith.constant 3 : index
    %18 = memref.load %arg2[%c3] : memref<6xf32, #tpu.memory_space<smem>>
    %19 = vector.broadcast %18 : f32 to vector<1x512xf32>
    %20 = arith.mulf %17, %19 : vector<1x512xf32>
    %c1_9 = arith.constant 1 : index
    %c0_10 = arith.constant 0 : index
    %21 = vector.load %arg1[%c1_9, %c0_10] : memref<3x512xf32, #tpu.memory_space<vmem>>, vector<1x512xf32>
    %c4 = arith.constant 4 : index
    %22 = memref.load %arg2[%c4] : memref<6xf32, #tpu.memory_space<smem>>
    %23 = vector.broadcast %22 : f32 to vector<1x512xf32>
    %24 = arith.mulf %21, %23 : vector<1x512xf32>
    %25 = arith.addf %20, %24 : vector<1x512xf32>
    %c2_11 = arith.constant 2 : index
    %c0_12 = arith.constant 0 : index
    %26 = vector.load %arg1[%c2_11, %c0_12] : memref<3x512xf32, #tpu.memory_space<vmem>>, vector<1x512xf32>
    %c5 = arith.constant 5 : index
    %27 = memref.load %arg2[%c5] : memref<6xf32, #tpu.memory_space<smem>>
    %28 = vector.broadcast %27 : f32 to vector<1x512xf32>
    %29 = arith.mulf %26, %28 : vector<1x512xf32>
    %30 = arith.addf %25, %29 : vector<1x512xf32>
    %c1_13 = arith.constant 1 : index
    %31 = memref.load %arg3[%c1_13] : memref<2xf32, #tpu.memory_space<smem>>
    %32 = vector.broadcast %31 : f32 to vector<1x512xf32>
    %33 = arith.addf %30, %32 : vector<1x512xf32>
    %34 = tpu.concatenate %16, %33 in 0 : vector<1x512xf32>, vector<1x512xf32> -> vector<2x512xf32>
    %c0_14 = arith.constant 0 : index
    %c0_15 = arith.constant 0 : index
    %35 = vector.load %arg4[%c0_14, %c0_15] : memref<2x512xf32, #tpu.memory_space<vmem>>, vector<2x512xf32>
    tpu.vector_store %arg4[%c0_14, %c0_15], %34 {strides = array<i32>} : memref<2x512xf32, #tpu.memory_space<vmem>>, vector<2x512xf32>,
    return
  }
  func.func @transform_0(%arg0: i32) -> (i32, i32) {
    %c0_i32 = arith.constant 0 : i32
    %c0_i32_0 = arith.constant 0 : i32
    return %c0_i32, %arg0 : i32, i32
  }
  func.func @transform_1(%arg0: i32) -> i32 {
    %c0_i32 = arith.constant 0 : i32
    %c0_i32_0 = arith.constant 0 : i32
    return %c0_i32 : i32
  }
  func.func @transform_2(%arg0: i32) -> i32 {
    %c0_i32 = arith.constant 0 : i32
    %c0_i32_0 = arith.constant 0 : i32
    return %c0_i32 : i32
  }
  func.func @transform_3(%arg0: i32) -> (i32, i32) {
    %c0_i32 = arith.constant 0 : i32
    %c0_i32_0 = arith.constant 0 : i32
    return %c0_i32, %arg0 : i32, i32
  }
}

</mosaic_0001>

<bundles_post_ra>
// kernel: tpu_custom_call.1
= control target key start
LH: loop header
LB: loop body
LE: loop exit
PB: predicated region body
PF: predicated region fallthrough
CT: control target
= control target key end

     0   :  { %8 = vsyncpa [#allocation3], 0  ;;  %s317_s0 = inlined_call_operand.hbm [shape: f32[3,512], index: 0, kind: input, shape index: {}]   ;;  %s318_s1 = inlined_call_operand.vmem [shape: f32[6], index: 1, kind: input, shape index: {}]   ;;  %s319_s2 = inlined_call_operand.vmem [shape: f32[2], index: 2, kind: input, shape index: {}]   ;;  %s320_s3 = inlined_call_operand.hbm [shape: f32[2,512], index: 3, kind: output, shape index: {}]  }
   0x1   :  { %9 = vsyncpa [#allocation5], 0 }
   0x2   :  { %10 = vsyncpa [#allocation8], 0 }
   0x3   :  { %11 = vsyncpa [#allocation4], 0  ;;  %s28_s14 = sshll.u32 %s318_s1, 4  ;;  %s259_s15 = smov [#allocation2]   ;;  %s29_s14 = int_to_ptr.vmem [resolvable:$true] %s28_s14 }
   0x4   :  { %s18_s16 = sshll.u32 %s259_s15, 4  ;;  %s183_s19 = scalar_lea.hbm %s317_s0, 256  ;;  %s19_s16 = int_to_ptr.vmem [resolvable:$true] %s18_s16 }
   0x5   :  { %p184_p0 = scmp.ne.s32.totalorder %s317_s0, %s183_s19  ;;  %p187_p1 = scmp.lt.u32.totalorder %s183_s19, %s317_s0 }
   0x7   :  { %p189_p2 = pnand %p187_p1, %p184_p0 }
   0x9   :  { %192 = shalt.err (!%p189_p2)
}
   0xa   :  { %s193_s24 = scalar_lea.vmem %s19_s16, 256  ;;  %p198_p4 = scmp.lt.s32.totalorder %s19_s16, %s19_s16 }
   0xb   :  { %p194_p3 = scmp.ne.s32.totalorder %s19_s16, %s193_s24  ;;  %p199_p5 = scmp.lt.s32.totalorder %s193_s24, %s193_s24 }
   0xd   :  { %p200_p6 = por %p199_p5, %p198_p4 }
   0xf   :  { %p201_p7 = pnand %p200_p6, %p194_p3 }
  0x11   :  { %204 = shalt.err (!%p201_p7)
}
  0x12   :  { %21 = dma.hbm_to_vmem [thread:$0]  %s317_s0, 256, %s19_s16, [#allocation3]  }
  0x13   :  { %s205_s26 = scalar_lea.vmem %s29_s14, 16  ;;  %p210_p9 = scmp.lt.s32.totalorder %s29_s14, %s29_s14 }
  0x14   :  { %p206_p8 = scmp.ne.s32.totalorder %s29_s14, %s205_s26  ;;  %p211_p10 = scmp.lt.s32.totalorder %s205_s26, %s205_s26 }
  0x16   :  { %p212_p11 = por %p211_p10, %p210_p9 }
  0x18   :  { %p213_p12 = pnand %p212_p11, %p206_p8 }
  0x1a   :  { %216 = shalt.err (!%p213_p12)
}
  0x1b   :  { %s260_s27 = smov [#allocation6]   ;;  %s38_s30 = sshll.u32 %s319_s2, 4  ;;  %s39_s30 = int_to_ptr.vmem [resolvable:$true] %s38_s30 }
  0x1c   :  { %31 = dma.vmem_to_smem %s29_s14, 16, %s260_s27, [#allocation5]  }
  0x1d   :  { %s217_s4 = scalar_lea.vmem %s39_s30, 16  ;;  %p222_p0 = scmp.lt.s32.totalorder %s39_s30, %s39_s30 }
  0x1e   :  { %p218_p13 = scmp.ne.s32.totalorder %s39_s30, %s217_s4  ;;  %p223_p1 = scmp.lt.s32.totalorder %s217_s4, %s217_s4 }
  0x20   :  { %p224_p2 = por %p223_p1, %p222_p0 }
  0x22   :  { %p225_p3 = pnand %p224_p2, %p218_p13 }
  0x24   :  { %228 = shalt.err (!%p225_p3)
}
  0x25   :  { %s261_s0 = smov [#allocation7]  }
  0x26   :  { %41 = dma.vmem_to_smem %s39_s30, 16, %s261_s0, [#allocation8]  }
  0x27   :  { %251 = dma.done.wait [#allocation3], 256  }
  0x28   :  { %252 = vsyncadd [#allocation3], 4294967040 }
  0x29   :  { %253 = dma.done.wait [#allocation5], 16  }
  0x2a   :  { %254 = vsyncadd [#allocation5], 4294967280 }
  0x2b   :  { %255 = dma.done.wait [#allocation8], 16  }
  0x2c   :  { %256 = vsyncadd [#allocation8], 4294967280 }
  0x2d   :  { %51 = sfence }
  0x2e   :  { %s53_s5 = sld [smem:[#allocation6]]  ;;  %s172_s6 = sld [smem:[#allocation6 + $0x1]]  ;;  %v52_v0 = vld [vmem:[#allocation2] ss:$4 sm:$0xf]  ;;  %v86_v1 = vlaneseq  ;;  %vm127_vm0 = vcmask 1040384  }
  0x2f   :  { %s173_s2 = sld [smem:[#allocation6 + $0x2]]  ;;  %s302_s7 = sld [smem:[#allocation7]]  ;;  %v57_v2 = vld [vmem:[#allocation2 + $0x1] ss:$4 sm:$0xf] }
  0x30   :  { %s174_s8 = sld [smem:[#allocation6 + $0x3]]  ;;  %s175_s9 = sld [smem:[#allocation6 + $0x4]]  ;;  %v63_v4 = vld [vmem:[#allocation2 + $0x2] ss:$4 sm:$0xf]  ;;  %v87_v9 = vshrl.u32 %v86_v1, 7 }
  0x31   :  { %s176_s10 = sld [smem:[#allocation6 + $0x5]]  ;;  %s177_s11 = sld [smem:[#allocation7 + $0x1]]  ;;  %v262_v21 = vmov 1983009808  }
  0x32   :  { %v88_v20 = vsub.s32 0, %v87_v9  ;;  %v139_v22 = vunpack.c.l.s4 %v262_v21  ;;  %v92_v24 = vsub.s32 1, %v87_v9  ;;  %v96_v25 = vsub.s32 2, %v87_v9  ;;  %s263_s12 = smov [#allocation9]  }
  0x33   :  { %v100_v26 = vsub.s32 3, %v87_v9  ;;  %s161_s13 = sshll.u32 %s263_s12, 4  ;;  %s162_s13 = int_to_ptr.vmem [resolvable:$true] %s161_s13 }
  0x34   :  { %v54_v3 = vstv %s53_s5  ;;  %v59_v6 = vstv %s172_s6  ;;  %v140_v31 = vunpack.c.0.s8 %v139_v22  ;;  %s229_s14 = scalar_lea.vmem %s162_s13, 128  ;;  %p234_p5 = scmp.lt.s32.totalorder %s162_s13, %s162_s13 }
  0x35   :  { %v55_v5 = vmul.f32 %v54_v3, %v52_v0  ;;  %v60_v7 = vmul.f32 %v59_v6, %v57_v2  ;;  %v65_v8 = vstv %s173_s2  ;;  %v69_v16 = vstv %s302_s7  ;;  %p230_p4 = scmp.ne.s32.totalorder %s162_s13, %s229_s14  ;;  %p235_p6 = scmp.lt.s32.totalorder %s229_s14, %s229_s14 }
  0x36   :  { %v66_v10 = vmul.f32 %v65_v8, %v63_v4  ;;  %v72_v11 = vstv %s174_s8  ;;  %v75_v14 = vstv %s175_s9  ;;  %v143_v40 = vsub.s32 %v140_v31, %v87_v9 }
  0x37   :  { %v61_v12 = vadd.f32 %v60_v7, %v55_v5  ;;  %v73_v13 = vmul.f32 %v72_v11, %v52_v0  ;;  %v79_v15 = vstv %s176_s10  ;;  %v76_v17 = vmul.f32 %v75_v14, %v57_v2  ;;  %p236_p7 = por %p235_p6, %p234_p5 }
  0x38   :  { %v80_v18 = vmul.f32 %v79_v15, %v63_v4  ;;  %v83_v28 = vstv %s177_s11 }
  0x39   :  { %v67_v19 = vadd.f32 %v66_v10, %v61_v12  ;;  %v77_v23 = vadd.f32 %v76_v17, %v73_v13  ;;  %p237_p8 = pnand %p236_p7, %p230_p4 }
  0x3b   :  { %v70_v27 = vadd.f32 %v69_v16, %v67_v19  ;;  %v81_v29 = vadd.f32 %v80_v18, %v77_v23 }
  0x3d   :  { %v89_v30 = vrot.slane %v70_v27, %v88_v20  ;;  %v84_v32 = vadd.f32 %v83_v28, %v81_v29  ;;  %v93_v33 = vrot.slane %v70_v27, %v92_v24  ;;  %v97_v34 = vrot.slane %v70_v27, %v96_v25 }
  0x3e   :  { %v101_v35 = vrot.slane %v70_v27, %v100_v26 }
  0x3f   :  { %v110_v36 = vrot.slane %v84_v32, %v88_v20  ;;  %v114_v37 = vrot.slane %v84_v32, %v92_v24  ;;  %v118_v38 = vrot.slane %v84_v32, %v96_v25  ;;  %v122_v39 = vrot.slane %v84_v32, %v100_v26 }
  0x41   :  { %v128_v41 = vsel %vm127_vm0, %v89_v30, %v110_v36  ;;  %v129_v42 = vsel %vm127_vm0, %v93_v33, %v114_v37  ;;  %v130_v43 = vsel %vm127_vm0, %v97_v34, %v118_v38  ;;  %v131_v44 = vsel %vm127_vm0, %v101_v35, %v122_v39 }
  0x42   :  { %v136_v45 = vcombine.low %v128_v41, %v129_v42  ;;  %v137_v46 = vcombine.low %v130_v43, %v131_v44 }
  0x44   :  { %v144_v47 = vrot.slane %v136_v45, %v143_v40  ;;  %v151_v48 = vrot.slane %v137_v46, %v143_v40 }
  0x46   :  { %v152_v49 = vcombine.low %v144_v47, %v151_v48 }
  0x48   :  { %154 = vst [vmem:[#allocation9] sm:$0xff] %v152_v49 }
  0x49   :  { %240 = shalt.err (!%p237_p8)
}
  0x4a   :  { %s241_s17 = scalar_lea.hbm %s320_s3, 128 }
  0x4b   :  { %p242_p9 = scmp.ne.s32.totalorder %s320_s3, %s241_s17  ;;  %p245_p10 = scmp.lt.u32.totalorder %s241_s17, %s320_s3 }
  0x4d   :  { %p247_p11 = pnand %p245_p10, %p242_p9 }
  0x4f   :  { %250 = shalt.err (!%p247_p11)
}
  0x50   :  { %164 = dma.vmem_to_hbm [thread:$0]  %s162_s13, 128, %s320_s3, [#allocation4]  }
  0x51   :  { %257 = dma.done.wait [#allocation4], 128  }
  0x52   :  { %258 = vsyncadd [#allocation4], 4294967168 }
  0x53   :  { %168 = vsyncpa [#allocation3], 1 }
  0x54   :  { %169 = vsyncpa [#allocation4], 1 }
  0x55   :  { %170 = vsyncpa [#allocation5], 1 }
  0x56   :  { %171 = vsyncpa [#allocation8], 1 }

</bundles_post_ra>
